<compile_context>
chip_gen: v7x
topology: tpu7x:2x2x1
jax: 0.10.0
libtpu: 0.0.40
codegen_flags: <defaults>
</compile_context>

<pallas_src>
import numpy as np
import jax
import jax.numpy as jnp
from jax import lax
from jax.experimental import pallas as pl
from jax.experimental.pallas import tpu as pltpu


# -----------------------------------------------------------------------------
# Kernel
# -----------------------------------------------------------------------------
def _pnet2_kernel(x_ref, w1e_ref, w1o_ref, b1_ref, w2_ref, b2_ref,
                  w3_ref, b3_ref, wh_ref, bh_ref, sg_ref, alpha_ref, out_ref):
    f32 = jnp.float32
    R0 = x_ref.shape[0]          # Hin * b_blk fused (image, y) rows
    R1 = R0 - 2                  # conv1 output rows
    R1h = R1 - 1                 # after adjacent-row (H) max
    R2 = R1h - 4                 # conv2 output rows (taps shift by 2*kh)
    R3 = R2 - 4                  # conv3 / head output rows

    def band_mm(lhs_list, w_ref):
        acc = None
        for kh in range(3):
            p = jnp.dot(lhs_list[kh], w_ref[kh], preferred_element_type=f32)
            acc = p if acc is None else acc + p
        return acc

    # ---- conv1 (3 -> 10): banded matmuls at even / odd W output phase -------
    taps = [x_ref[pl.ds(kh, R1), :].astype(jnp.bfloat16) for kh in range(3)]
    b1 = b1_ref[...]
    h1e = band_mm(taps, w1e_ref) + b1            # (R1, Wp*10), even W phase
    h1o = band_mm(taps, w1o_ref) + b1            # (R1, Wp*10), odd  W phase

    # ---- 2x2 max-pool (W via phase max, H via adjacent-row max), PReLU #0 ---
    wmax = jnp.maximum(h1e, h1o)
    hmax = jnp.maximum(wmax[0:R1h, :], wmax[1:R1h + 1, :])
    a0 = alpha_ref[0]
    p1 = jnp.where(hmax > 0, hmax, hmax * a0)    # valid rows at stride 2

    # ---- conv2 (10 -> 16) and conv3 (16 -> 32): banded matmuls + PReLU ------
    def conv_band(xv, nrows, w_ref, b_ref, alpha):
        lhs = [xv[2 * kh:2 * kh + nrows, :].astype(jnp.bfloat16)
               for kh in range(3)]
        acc = band_mm(lhs, w_ref) + b_ref[...]
        return jnp.where(acc > 0, acc, acc * alpha)

    h2 = conv_band(p1, R2, w2_ref, b2_ref, alpha_ref[1])      # (R2, W2*16)
    h3 = conv_band(h2, R3, w3_ref, b3_ref, alpha_ref[2])      # (R3, W3*32)

    # ---- fused 1x1 heads (block-diagonal weight); sigmoid on conf lanes -----
    z = jnp.dot(h3.astype(jnp.bfloat16), wh_ref[...],
                preferred_element_type=f32) + bh_ref[...]     # (R3, W3*16)
    sig = 1.0 / (1.0 + jnp.exp(-z))
    g = sg_ref[...]                                           # (1, W3*16) 0/1
    z = g * sig + (1.0 - g) * z

    out_ref[pl.ds(0, R3), :] = z
    out_ref[pl.ds(R3, R0 - R3), :] = jnp.zeros((R0 - R3, z.shape[1]), f32)


# -----------------------------------------------------------------------------
# Wrapper: banded-weight construction + pallas_call
# -----------------------------------------------------------------------------
def _sel(n_in, n_out, stride, shift):
    s = np.zeros((n_in, n_out), np.float32)
    for j in range(n_out):
        s[stride * j + shift, j] = 1.0
    return s


def _bands(w9, sels):
    """w9: (9, Cin, Cout) taps (row = kh*3+kw); sels[kw]: (n_in, n_out) numpy.
    Returns (3, n_in*Cin, n_out*Cout) bf16 banded weights, one per kh."""
    out = []
    for kh in range(3):
        acc = None
        for kw in range(3):
            blk = jnp.kron(jnp.asarray(sels[kw]), w9[kh * 3 + kw])
            acc = blk if acc is None else acc + blk
        out.append(acc)
    return jnp.stack(out, axis=0).astype(jnp.bfloat16)


def pnet2_forward(x_nchw, params):
    (w1, b1, w2, b2, w3, b3, alphas, wc, bc, wo, bo, wk, bk) = params
    N, Cin, Hin, Win = x_nchw.shape
    assert Cin == 3 and Hin % 2 == 0 and Win % 2 == 0 and Hin >= 12 and Win >= 12
    Wp = (Win - 2) // 2
    W2 = Wp - 2
    W3 = W2 - 2
    H3 = (Hin - 2) // 2 - 4
    L0, Lh = Win * 3, W3 * 16

    # ---- batch blocking: >=2 grid steps when N>=2 (megacore), <=32 img/step --
    if N <= 1:
        grid_n = 1
    else:
        grid_n = max(2, -(-N // 32))
    b_blk = -(-N // grid_n)
    Npad = grid_n * b_blk

    # ---- lane-merged input: rows = (image, y), lanes = (x, channel) ----------
    xh = jnp.transpose(x_nchw, (0, 2, 3, 1)).astype(jnp.float32)
    if Npad != N:
        xh = jnp.pad(xh, ((0, Npad - N), (0, 0), (0, 0), (0, 0)))
    x2d = xh.reshape(Npad * Hin, L0)

    # ---- banded weights (built once, outside the kernel) ---------------------
    w1e = _bands(w1, [_sel(Win, Wp, 2, kw) for kw in range(3)])      # even W
    w1o = _bands(w1, [_sel(Win, Wp, 2, kw + 1) for kw in range(3)])  # odd  W
    w2b = _bands(w2, [_sel(Wp, W2, 1, kw) for kw in range(3)])
    w3b = _bands(w3, [_sel(W2, W3, 1, kw) for kw in range(3)])
    wh16 = jnp.pad(jnp.concatenate([wc, wo, wk], axis=1), ((0, 0), (0, 1)))
    whb = jnp.kron(jnp.asarray(np.eye(W3, dtype=np.float32)),
                   wh16).astype(jnp.bfloat16)                        # (W3*32, Lh)

    b1r = jnp.tile(b1.astype(jnp.float32), (1, Wp))
    b2r = jnp.tile(b2.astype(jnp.float32), (1, W2))
    b3r = jnp.tile(b3.astype(jnp.float32), (1, W3))
    bh16 = jnp.pad(jnp.concatenate([bc, bo, bk], axis=1), ((0, 0), (0, 1)))
    bhr = jnp.tile(bh16.astype(jnp.float32), (1, W3))
    sgate = np.zeros((1, Lh), np.float32)
    sgate[0, 0::16] = 1.0                       # confidence lanes get sigmoid
    sgate = jnp.asarray(sgate)

    full = lambda a: pl.BlockSpec(a.shape, lambda n, nd=a.ndim: (0,) * nd)
    in_specs = [
        pl.BlockSpec((Hin * b_blk, L0), lambda n: (n, 0)),
        full(w1e), full(w1o), full(b1r),
        full(w2b), full(b2r), full(w3b), full(b3r),
        full(whb), full(bhr), full(sgate),
        pl.BlockSpec((3,), lambda n: (0,),
                     memory_space=pltpu.MemorySpace.SMEM),
    ]
    out = pl.pallas_call(
        _pnet2_kernel,
        out_shape=jax.ShapeDtypeStruct((Npad * Hin, Lh), jnp.float32),
        grid_spec=pltpu.PrefetchScalarGridSpec(
            num_scalar_prefetch=0,
            grid=(grid_n,),
            in_specs=in_specs,
            out_specs=pl.BlockSpec((Hin * b_blk, Lh), lambda n: (n, 0)),
        ),
        compiler_params=pltpu.CompilerParams(
            dimension_semantics=("parallel",),
            vmem_limit_bytes=48 * 1024 * 1024),
    )(x2d, w1e, w1o, b1r, w2b, b2r, w3b, b3r, whb, bhr, sgate, alphas)

    # ---- unpack: valid H rows of each image block are 0, 2, ..., 2*(H3-1) ----
    o = out.reshape(Npad, Hin, Lh)[:N, 0:2 * H3:2, :]       # (N, H3, Lh)
    o = o.reshape(N, H3, W3, 16)
    to_nchw = lambda t: jnp.transpose(t, (0, 3, 1, 2))
    conf = to_nchw(o[..., 0:1])
    off = to_nchw(o[..., 1:5])
    kp = to_nchw(o[..., 5:15])
    return conf, off, kp


# -----------------------------------------------------------------------------
# Params + pure-JAX reference (correctness check)
# -----------------------------------------------------------------------------
def init_params(key):
    ks = jax.random.split(key, 12)
    w = lambda k, shape: 0.1 * jax.random.normal(k, shape, jnp.float32)
    w1 = w(ks[0], (9, 3, 10));   b1 = w(ks[1], (1, 10))
    w2 = w(ks[2], (9, 10, 16));  b2 = w(ks[3], (1, 16))
    w3 = w(ks[4], (9, 16, 32));  b3 = w(ks[5], (1, 32))
    alphas = jnp.full((3,), 0.25, jnp.float32)   # nn.PReLU() default init
    wc = w(ks[6], (32, 1));   bc = w(ks[7], (1, 1))
    wo = w(ks[8], (32, 4));   bo = w(ks[9], (1, 4))
    wk = w(ks[10], (32, 10)); bk = w(ks[11], (1, 10))
    return (w1, b1, w2, b2, w3, b3, alphas, wc, bc, wo, bo, wk, bk)


def pnet2_reference(x_nchw, params):
    """Pure-JAX f32 reference (XLA convs) for a correctness sanity check."""
    (w1, b1, w2, b2, w3, b3, alphas, wc, bc, wo, bo, wk, bk) = params
    x = jnp.transpose(x_nchw, (0, 2, 3, 1)).astype(jnp.float32)

    def conv(h, wf, b):
        w4 = wf.reshape(3, 3, wf.shape[1], wf.shape[2])
        y = lax.conv_general_dilated(
            h, w4, window_strides=(1, 1), padding='VALID',
            dimension_numbers=('NHWC', 'HWIO', 'NHWC'))
        return y + b[0]

    prelu = lambda v, a: jnp.where(v > 0, v, a * v)
    h = conv(x, w1, b1)
    h = lax.reduce_window(h, -jnp.inf, lax.max,
                          (1, 2, 2, 1), (1, 2, 2, 1), 'VALID')
    h = prelu(h, alphas[0])
    h = prelu(conv(h, w2, b2), alphas[1])
    h = prelu(conv(h, w3, b3), alphas[2])
    conf = jax.nn.sigmoid(jnp.einsum('nhwc,co->nhwo', h, wc) + bc[0])
    off = jnp.einsum('nhwc,co->nhwo', h, wo) + bo[0]
    kp = jnp.einsum('nhwc,co->nhwo', h, wk) + bk[0]
    to_nchw = lambda t: jnp.transpose(t, (0, 3, 1, 2))
    return to_nchw(conf), to_nchw(off), to_nchw(kp)


if __name__ == "__main__":
    key = jax.random.PRNGKey(0)
    kx, kparams = jax.random.split(key)
    params = init_params(kparams)
    # PyTorch-style NCHW input: batch=2, channels=3, spatial=16x16
    x = jax.random.normal(kx, (2, 3, 16, 16), jnp.float32)

    outs = jax.jit(pnet2_forward)(x, params)
    outs = jax.block_until_ready(outs)

    refs = pnet2_reference(x, params)
    expected_shapes = [(2, 1, 3, 3), (2, 4, 3, 3), (2, 10, 3, 3)]
    for o, r, s in zip(outs, refs, expected_shapes):
        assert o.shape == s, (o.shape, s)
        np.testing.assert_allclose(np.asarray(o), np.asarray(r),
                                   rtol=5e-2, atol=5e-2)
    print("KERNEL_OK")
</pallas_src>

<mosaic_0001>
module attributes {stable_mosaic.version = 11 : i64} {
  func.func @_pnet2_kernel(%arg0: i32, %arg1: memref<16x48xf32, #tpu.memory_space<vmem>>, %arg2: memref<3x48x70xbf16, #tpu.memory_space<vmem>>, %arg3: memref<3x48x70xbf16, #tpu.memory_space<vmem>>, %arg4: memref<1x70xf32, #tpu.memory_space<vmem>>, %arg5: memref<3x70x80xbf16, #tpu.memory_space<vmem>>, %arg6: memref<1x80xf32, #tpu.memory_space<vmem>>, %arg7: memref<3x80x96xbf16, #tpu.memory_space<vmem>>, %arg8: memref<1x96xf32, #tpu.memory_space<vmem>>, %arg9: memref<96x48xbf16, #tpu.memory_space<vmem>>, %arg10: memref<1x48xf32, #tpu.memory_space<vmem>>, %arg11: memref<1x48xf32, #tpu.memory_space<vmem>>, %arg12: memref<3xf32, #tpu.memory_space<smem>>, %arg13: memref<16x48xf32, #tpu.memory_space<vmem>>) attributes {dimension_semantics = [#tpu.dimension_semantics<parallel>], iteration_bounds = array<i64: 2>, scalar_prefetch = 0 : i64, scratch_operands = 0 : i64, tpu.core_type = #tpu.core_type<tc>, window_params = [{transform_indices = @transform_0, window_bounds = array<i64: 16, 48>}, {pipeline_mode = #tpu.pipeline_mode<synchronous>, transform_indices = @transform_1, window_bounds = array<i64: 3, 48, 70>}, {pipeline_mode = #tpu.pipeline_mode<synchronous>, transform_indices = @transform_2, window_bounds = array<i64: 3, 48, 70>}, {pipeline_mode = #tpu.pipeline_mode<synchronous>, transform_indices = @transform_3, window_bounds = array<i64: 1, 70>}, {pipeline_mode = #tpu.pipeline_mode<synchronous>, transform_indices = @transform_4, window_bounds = array<i64: 3, 70, 80>}, {pipeline_mode = #tpu.pipeline_mode<synchronous>, transform_indices = @transform_5, window_bounds = array<i64: 1, 80>}, {pipeline_mode = #tpu.pipeline_mode<synchronous>, transform_indices = @transform_6, window_bounds = array<i64: 3, 80, 96>}, {pipeline_mode = #tpu.pipeline_mode<synchronous>, transform_indices = @transform_7, window_bounds = array<i64: 1, 96>}, {pipeline_mode = #tpu.pipeline_mode<synchronous>, transform_indices = @transform_8, window_bounds = array<i64: 96, 48>}, {pipeline_mode = #tpu.pipeline_mode<synchronous>, transform_indices = @transform_9, window_bounds = array<i64: 1, 48>}, {pipeline_mode = #tpu.pipeline_mode<synchronous>, transform_indices = @transform_10, window_bounds = array<i64: 1, 48>}, {transform_indices = @transform_11, window_bounds = array<i64: 3>}, {transform_indices = @transform_12, window_bounds = array<i64: 16, 48>}]} {
    %c0 = arith.constant 0 : index
    %c0_0 = arith.constant 0 : index
    %0 = vector.load %arg1[%c0, %c0_0] : memref<16x48xf32, #tpu.memory_space<vmem>>, vector<14x48xf32>
    %1 = arith.truncf %0 : vector<14x48xf32> to vector<14x48xbf16>
    %c1 = arith.constant 1 : index
    %c0_1 = arith.constant 0 : index
    %2 = vector.load %arg1[%c1, %c0_1] : memref<16x48xf32, #tpu.memory_space<vmem>>, vector<14x48xf32>
    %3 = arith.truncf %2 : vector<14x48xf32> to vector<14x48xbf16>
    %c2 = arith.constant 2 : index
    %c0_2 = arith.constant 0 : index
    %4 = vector.load %arg1[%c2, %c0_2] : memref<16x48xf32, #tpu.memory_space<vmem>>, vector<14x48xf32>
    %5 = arith.truncf %4 : vector<14x48xf32> to vector<14x48xbf16>
    %c0_3 = arith.constant 0 : index
    %c0_4 = arith.constant 0 : index
    %6 = vector.load %arg4[%c0_3, %c0_4] : memref<1x70xf32, #tpu.memory_space<vmem>>, vector<1x70xf32>
    %c0_5 = arith.constant 0 : index
    %c0_6 = arith.constant 0 : index
    %c0_7 = arith.constant 0 : index
    %7 = vector.load %arg2[%c0_5, %c0_6, %c0_7] : memref<3x48x70xbf16, #tpu.memory_space<vmem>>, vector<1x48x70xbf16>
    %8 = vector.shape_cast %7 : vector<1x48x70xbf16> to vector<48x70xbf16>
    %cst = arith.constant dense<0.000000e+00> : vector<14x70xf32>
    %9 = tpu.matmul %1, %8, %cst {dimension_numbers = #tpu.dot_dimension_numbers<[1], [0], [0], [1], [0, 0, 1, 1], [], []>} : vector<14x48xbf16>, vector<48x70xbf16>, vector<14x70xf32> -> vector<14x70xf32>
    %c1_8 = arith.constant 1 : index
    %c0_9 = arith.constant 0 : index
    %c0_10 = arith.constant 0 : index
    %10 = vector.load %arg2[%c1_8, %c0_9, %c0_10] : memref<3x48x70xbf16, #tpu.memory_space<vmem>>, vector<1x48x70xbf16>
    %11 = vector.shape_cast %10 : vector<1x48x70xbf16> to vector<48x70xbf16>
    %cst_11 = arith.constant dense<0.000000e+00> : vector<14x70xf32>
    %12 = tpu.matmul %3, %11, %cst_11 {dimension_numbers = #tpu.dot_dimension_numbers<[1], [0], [0], [1], [0, 0, 1, 1], [], []>} : vector<14x48xbf16>, vector<48x70xbf16>, vector<14x70xf32> -> vector<14x70xf32>
    %13 = arith.addf %9, %12 : vector<14x70xf32>
    %c2_12 = arith.constant 2 : index
    %c0_13 = arith.constant 0 : index
    %c0_14 = arith.constant 0 : index
    %14 = vector.load %arg2[%c2_12, %c0_13, %c0_14] : memref<3x48x70xbf16, #tpu.memory_space<vmem>>, vector<1x48x70xbf16>
    %15 = vector.shape_cast %14 : vector<1x48x70xbf16> to vector<48x70xbf16>
    %cst_15 = arith.constant dense<0.000000e+00> : vector<14x70xf32>
    %16 = tpu.matmul %5, %15, %cst_15 {dimension_numbers = #tpu.dot_dimension_numbers<[1], [0], [0], [1], [0, 0, 1, 1], [], []>} : vector<14x48xbf16>, vector<48x70xbf16>, vector<14x70xf32> -> vector<14x70xf32>
    %17 = arith.addf %13, %16 : vector<14x70xf32>
    %18 = vector.broadcast %6 : vector<1x70xf32> to vector<14x70xf32>
    %19 = arith.addf %17, %18 : vector<14x70xf32>
    %c0_16 = arith.constant 0 : index
    %c0_17 = arith.constant 0 : index
    %c0_18 = arith.constant 0 : index
    %20 = vector.load %arg3[%c0_16, %c0_17, %c0_18] : memref<3x48x70xbf16, #tpu.memory_space<vmem>>, vector<1x48x70xbf16>
    %21 = vector.shape_cast %20 : vector<1x48x70xbf16> to vector<48x70xbf16>
    %cst_19 = arith.constant dense<0.000000e+00> : vector<14x70xf32>
    %22 = tpu.matmul %1, %21, %cst_19 {dimension_numbers = #tpu.dot_dimension_numbers<[1], [0], [0], [1], [0, 0, 1, 1], [], []>} : vector<14x48xbf16>, vector<48x70xbf16>, vector<14x70xf32> -> vector<14x70xf32>
    %c1_20 = arith.constant 1 : index
    %c0_21 = arith.constant 0 : index
    %c0_22 = arith.constant 0 : index
    %23 = vector.load %arg3[%c1_20, %c0_21, %c0_22] : memref<3x48x70xbf16, #tpu.memory_space<vmem>>, vector<1x48x70xbf16>
    %24 = vector.shape_cast %23 : vector<1x48x70xbf16> to vector<48x70xbf16>
    %cst_23 = arith.constant dense<0.000000e+00> : vector<14x70xf32>
    %25 = tpu.matmul %3, %24, %cst_23 {dimension_numbers = #tpu.dot_dimension_numbers<[1], [0], [0], [1], [0, 0, 1, 1], [], []>} : vector<14x48xbf16>, vector<48x70xbf16>, vector<14x70xf32> -> vector<14x70xf32>
    %26 = arith.addf %22, %25 : vector<14x70xf32>
    %c2_24 = arith.constant 2 : index
    %c0_25 = arith.constant 0 : index
    %c0_26 = arith.constant 0 : index
    %27 = vector.load %arg3[%c2_24, %c0_25, %c0_26] : memref<3x48x70xbf16, #tpu.memory_space<vmem>>, vector<1x48x70xbf16>
    %28 = vector.shape_cast %27 : vector<1x48x70xbf16> to vector<48x70xbf16>
    %cst_27 = arith.constant dense<0.000000e+00> : vector<14x70xf32>
    %29 = tpu.matmul %5, %28, %cst_27 {dimension_numbers = #tpu.dot_dimension_numbers<[1], [0], [0], [1], [0, 0, 1, 1], [], []>} : vector<14x48xbf16>, vector<48x70xbf16>, vector<14x70xf32> -> vector<14x70xf32>
    %30 = arith.addf %26, %29 : vector<14x70xf32>
    %31 = vector.broadcast %6 : vector<1x70xf32> to vector<14x70xf32>
    %32 = arith.addf %30, %31 : vector<14x70xf32>
    %33 = arith.maximumf %19, %32 : vector<14x70xf32>
    %34 = vector.extract_strided_slice %33 {offsets = [0, 0], sizes = [13, 70], strides = [1, 1]} : vector<14x70xf32> to vector<13x70xf32>
    %35 = vector.extract_strided_slice %33 {offsets = [1, 0], sizes = [13, 70], strides = [1, 1]} : vector<14x70xf32> to vector<13x70xf32>
    %36 = arith.maximumf %34, %35 : vector<13x70xf32>
    %c0_28 = arith.constant 0 : index
    %37 = memref.load %arg12[%c0_28] : memref<3xf32, #tpu.memory_space<smem>>
    %cst_29 = arith.constant 0.000000e+00 : f32
    %38 = vector.broadcast %cst_29 : f32 to vector<13x70xf32>
    %39 = arith.cmpf ogt, %36, %38 : vector<13x70xf32>
    %40 = vector.broadcast %37 : f32 to vector<13x70xf32>
    %41 = arith.mulf %36, %40 : vector<13x70xf32>
    %42 = arith.select %39, %36, %41 : vector<13x70xi1>, vector<13x70xf32>
    %c1_30 = arith.constant 1 : index
    %43 = memref.load %arg12[%c1_30] : memref<3xf32, #tpu.memory_space<smem>>
    %44 = vector.extract_strided_slice %42 {offsets = [0, 0], sizes = [9, 70], strides = [1, 1]} : vector<13x70xf32> to vector<9x70xf32>
    %45 = arith.truncf %44 : vector<9x70xf32> to vector<9x70xbf16>
    %46 = vector.extract_strided_slice %42 {offsets = [2, 0], sizes = [9, 70], strides = [1, 1]} : vector<13x70xf32> to vector<9x70xf32>
    %47 = arith.truncf %46 : vector<9x70xf32> to vector<9x70xbf16>
    %48 = vector.extract_strided_slice %42 {offsets = [4, 0], sizes = [9, 70], strides = [1, 1]} : vector<13x70xf32> to vector<9x70xf32>
    %49 = arith.truncf %48 : vector<9x70xf32> to vector<9x70xbf16>
    %c0_31 = arith.constant 0 : index
    %c0_32 = arith.constant 0 : index
    %c0_33 = arith.constant 0 : index
    %50 = vector.load %arg5[%c0_31, %c0_32, %c0_33] : memref<3x70x80xbf16, #tpu.memory_space<vmem>>, vector<1x70x80xbf16>
    %51 = vector.shape_cast %50 : vector<1x70x80xbf16> to vector<70x80xbf16>
    %cst_34 = arith.constant dense<0.000000e+00> : vector<9x80xf32>
    %52 = tpu.matmul %45, %51, %cst_34 {dimension_numbers = #tpu.dot_dimension_numbers<[1], [0], [0], [1], [0, 0, 1, 1], [], []>} : vector<9x70xbf16>, vector<70x80xbf16>, vector<9x80xf32> -> vector<9x80xf32>
    %c1_35 = arith.constant 1 : index
    %c0_36 = arith.constant 0 : index
    %c0_37 = arith.constant 0 : index
    %53 = vector.load %arg5[%c1_35, %c0_36, %c0_37] : memref<3x70x80xbf16, #tpu.memory_space<vmem>>, vector<1x70x80xbf16>
    %54 = vector.shape_cast %53 : vector<1x70x80xbf16> to vector<70x80xbf16>
    %cst_38 = arith.constant dense<0.000000e+00> : vector<9x80xf32>
    %55 = tpu.matmul %47, %54, %cst_38 {dimension_numbers = #tpu.dot_dimension_numbers<[1], [0], [0], [1], [0, 0, 1, 1], [], []>} : vector<9x70xbf16>, vector<70x80xbf16>, vector<9x80xf32> -> vector<9x80xf32>
    %56 = arith.addf %52, %55 : vector<9x80xf32>
    %c2_39 = arith.constant 2 : index
    %c0_40 = arith.constant 0 : index
    %c0_41 = arith.constant 0 : index
    %57 = vector.load %arg5[%c2_39, %c0_40, %c0_41] : memref<3x70x80xbf16, #tpu.memory_space<vmem>>, vector<1x70x80xbf16>
    %58 = vector.shape_cast %57 : vector<1x70x80xbf16> to vector<70x80xbf16>
    %cst_42 = arith.constant dense<0.000000e+00> : vector<9x80xf32>
    %59 = tpu.matmul %49, %58, %cst_42 {dimension_numbers = #tpu.dot_dimension_numbers<[1], [0], [0], [1], [0, 0, 1, 1], [], []>} : vector<9x70xbf16>, vector<70x80xbf16>, vector<9x80xf32> -> vector<9x80xf32>
    %60 = arith.addf %56, %59 : vector<9x80xf32>
    %c0_43 = arith.constant 0 : index
    %c0_44 = arith.constant 0 : index
    %61 = vector.load %arg6[%c0_43, %c0_44] : memref<1x80xf32, #tpu.memory_space<vmem>>, vector<1x80xf32>
    %62 = vector.broadcast %61 : vector<1x80xf32> to vector<9x80xf32>
    %63 = arith.addf %60, %62 : vector<9x80xf32>
    %cst_45 = arith.constant 0.000000e+00 : f32
    %64 = vector.broadcast %cst_45 : f32 to vector<9x80xf32>
    %65 = arith.cmpf ogt, %63, %64 : vector<9x80xf32>
    %66 = vector.broadcast %43 : f32 to vector<9x80xf32>
    %67 = arith.mulf %63, %66 : vector<9x80xf32>
    %68 = arith.select %65, %63, %67 : vector<9x80xi1>, vector<9x80xf32>
    %c2_46 = arith.constant 2 : index
    %69 = memref.load %arg12[%c2_46] : memref<3xf32, #tpu.memory_space<smem>>
    %70 = vector.extract_strided_slice %68 {offsets = [0, 0], sizes = [5, 80], strides = [1, 1]} : vector<9x80xf32> to vector<5x80xf32>
    %71 = arith.truncf %70 : vector<5x80xf32> to vector<5x80xbf16>
    %72 = vector.extract_strided_slice %68 {offsets = [2, 0], sizes = [5, 80], strides = [1, 1]} : vector<9x80xf32> to vector<5x80xf32>
    %73 = arith.truncf %72 : vector<5x80xf32> to vector<5x80xbf16>
    %74 = vector.extract_strided_slice %68 {offsets = [4, 0], sizes = [5, 80], strides = [1, 1]} : vector<9x80xf32> to vector<5x80xf32>
    %75 = arith.truncf %74 : vector<5x80xf32> to vector<5x80xbf16>
    %c0_47 = arith.constant 0 : index
    %c0_48 = arith.constant 0 : index
    %c0_49 = arith.constant 0 : index
    %76 = vector.load %arg7[%c0_47, %c0_48, %c0_49] : memref<3x80x96xbf16, #tpu.memory_space<vmem>>, vector<1x80x96xbf16>
    %77 = vector.shape_cast %76 : vector<1x80x96xbf16> to vector<80x96xbf16>
    %cst_50 = arith.constant dense<0.000000e+00> : vector<5x96xf32>
    %78 = tpu.matmul %71, %77, %cst_50 {dimension_numbers = #tpu.dot_dimension_numbers<[1], [0], [0], [1], [0, 0, 1, 1], [], []>} : vector<5x80xbf16>, vector<80x96xbf16>, vector<5x96xf32> -> vector<5x96xf32>
    %c1_51 = arith.constant 1 : index
    %c0_52 = arith.constant 0 : index
    %c0_53 = arith.constant 0 : index
    %79 = vector.load %arg7[%c1_51, %c0_52, %c0_53] : memref<3x80x96xbf16, #tpu.memory_space<vmem>>, vector<1x80x96xbf16>
    %80 = vector.shape_cast %79 : vector<1x80x96xbf16> to vector<80x96xbf16>
    %cst_54 = arith.constant dense<0.000000e+00> : vector<5x96xf32>
    %81 = tpu.matmul %73, %80, %cst_54 {dimension_numbers = #tpu.dot_dimension_numbers<[1], [0], [0], [1], [0, 0, 1, 1], [], []>} : vector<5x80xbf16>, vector<80x96xbf16>, vector<5x96xf32> -> vector<5x96xf32>
    %82 = arith.addf %78, %81 : vector<5x96xf32>
    %c2_55 = arith.constant 2 : index
    %c0_56 = arith.constant 0 : index
    %c0_57 = arith.constant 0 : index
    %83 = vector.load %arg7[%c2_55, %c0_56, %c0_57] : memref<3x80x96xbf16, #tpu.memory_space<vmem>>, vector<1x80x96xbf16>
    %84 = vector.shape_cast %83 : vector<1x80x96xbf16> to vector<80x96xbf16>
    %cst_58 = arith.constant dense<0.000000e+00> : vector<5x96xf32>
    %85 = tpu.matmul %75, %84, %cst_58 {dimension_numbers = #tpu.dot_dimension_numbers<[1], [0], [0], [1], [0, 0, 1, 1], [], []>} : vector<5x80xbf16>, vector<80x96xbf16>, vector<5x96xf32> -> vector<5x96xf32>
    %86 = arith.addf %82, %85 : vector<5x96xf32>
    %c0_59 = arith.constant 0 : index
    %c0_60 = arith.constant 0 : index
    %87 = vector.load %arg8[%c0_59, %c0_60] : memref<1x96xf32, #tpu.memory_space<vmem>>, vector<1x96xf32>
    %88 = vector.broadcast %87 : vector<1x96xf32> to vector<5x96xf32>
    %89 = arith.addf %86, %88 : vector<5x96xf32>
    %cst_61 = arith.constant 0.000000e+00 : f32
    %90 = vector.broadcast %cst_61 : f32 to vector<5x96xf32>
    %91 = arith.cmpf ogt, %89, %90 : vector<5x96xf32>
    %92 = vector.broadcast %69 : f32 to vector<5x96xf32>
    %93 = arith.mulf %89, %92 : vector<5x96xf32>
    %94 = arith.select %91, %89, %93 : vector<5x96xi1>, vector<5x96xf32>
    %95 = arith.truncf %94 : vector<5x96xf32> to vector<5x96xbf16>
    %c0_62 = arith.constant 0 : index
    %c0_63 = arith.constant 0 : index
    %96 = vector.load %arg9[%c0_62, %c0_63] : memref<96x48xbf16, #tpu.memory_space<vmem>>, vector<96x48xbf16>
    %cst_64 = arith.constant dense<0.000000e+00> : vector<5x48xf32>
    %97 = tpu.matmul %95, %96, %cst_64 {dimension_numbers = #tpu.dot_dimension_numbers<[1], [0], [0], [1], [0, 0, 1, 1], [], []>} : vector<5x96xbf16>, vector<96x48xbf16>, vector<5x48xf32> -> vector<5x48xf32>
    %c0_65 = arith.constant 0 : index
    %c0_66 = arith.constant 0 : index
    %98 = vector.load %arg10[%c0_65, %c0_66] : memref<1x48xf32, #tpu.memory_space<vmem>>, vector<1x48xf32>
    %99 = vector.broadcast %98 : vector<1x48xf32> to vector<5x48xf32>
    %100 = arith.addf %97, %99 : vector<5x48xf32>
    %cst_67 = arith.constant 0.000000e+00 : f32
    %101 = vector.broadcast %cst_67 : f32 to vector<5x48xf32>
    %102 = arith.subf %101, %100 : vector<5x48xf32>
    %103 = math.exp %102 : vector<5x48xf32>
    %cst_68 = arith.constant 1.000000e+00 : f32
    %104 = vector.broadcast %cst_68 : f32 to vector<5x48xf32>
    %105 = arith.addf %104, %103 : vector<5x48xf32>
    %cst_69 = arith.constant 1.000000e+00 : f32
    %106 = vector.broadcast %cst_69 : f32 to vector<5x48xf32>
    %107 = arith.divf %106, %105 : vector<5x48xf32>
    %c0_70 = arith.constant 0 : index
    %c0_71 = arith.constant 0 : index
    %108 = vector.load %arg11[%c0_70, %c0_71] : memref<1x48xf32, #tpu.memory_space<vmem>>, vector<1x48xf32>
    %109 = vector.broadcast %108 : vector<1x48xf32> to vector<5x48xf32>
    %110 = arith.mulf %109, %107 : vector<5x48xf32>
    %cst_72 = arith.constant 1.000000e+00 : f32
    %111 = vector.broadcast %cst_72 : f32 to vector<1x48xf32>
    %112 = arith.subf %111, %108 : vector<1x48xf32>
    %113 = vector.broadcast %112 : vector<1x48xf32> to vector<5x48xf32>
    %114 = arith.mulf %113, %100 : vector<5x48xf32>
    %115 = arith.addf %110, %114 : vector<5x48xf32>
    %c0_73 = arith.constant 0 : index
    %c0_74 = arith.constant 0 : index
    %116 = vector.load %arg13[%c0_73, %c0_74] : memref<16x48xf32, #tpu.memory_space<vmem>>, vector<5x48xf32>
    tpu.vector_store %arg13[%c0_73, %c0_74], %115 {strides = array<i32>} : memref<16x48xf32, #tpu.memory_space<vmem>>, vector<5x48xf32>,
    %cst_75 = arith.constant 0.000000e+00 : f32
    %117 = vector.broadcast %cst_75 : f32 to vector<11x48xf32>
    %c5 = arith.constant 5 : index
    %c0_76 = arith.constant 0 : index
    %118 = vector.load %arg13[%c5, %c0_76] : memref<16x48xf32, #tpu.memory_space<vmem>>, vector<11x48xf32>
    tpu.vector_store %arg13[%c5, %c0_76], %117 {strides = array<i32>} : memref<16x48xf32, #tpu.memory_space<vmem>>, vector<11x48xf32>,
    return
  }
  func.func @transform_0(%arg0: i32) -> (i32, i32) {
    %c0_i32 = arith.constant 0 : i32
    %c0_i32_0 = arith.constant 0 : i32
    return %arg0, %c0_i32 : i32, i32
  }
  func.func @transform_1(%arg0: i32) -> (i32, i32, i32) {
    %c0_i32 = arith.constant 0 : i32
    %c0_i32_0 = arith.constant 0 : i32
    %c0_i32_1 = arith.constant 0 : i32
    %c0_i32_2 = arith.constant 0 : i32
    return %c0_i32, %c0_i32_0, %c0_i32_1 : i32, i32, i32
  }
  func.func @transform_2(%arg0: i32) -> (i32, i32, i32) {
    %c0_i32 = arith.constant 0 : i32
    %c0_i32_0 = arith.constant 0 : i32
    %c0_i32_1 = arith.constant 0 : i32
    %c0_i32_2 = arith.constant 0 : i32
    return %c0_i32, %c0_i32_0, %c0_i32_1 : i32, i32, i32
  }
  func.func @transform_3(%arg0: i32) -> (i32, i32) {
    %c0_i32 = arith.constant 0 : i32
    %c0_i32_0 = arith.constant 0 : i32
    %c0_i32_1 = arith.constant 0 : i32
    return %c0_i32, %c0_i32_0 : i32, i32
  }
  func.func @transform_4(%arg0: i32) -> (i32, i32, i32) {
    %c0_i32 = arith.constant 0 : i32
    %c0_i32_0 = arith.constant 0 : i32
    %c0_i32_1 = arith.constant 0 : i32
    %c0_i32_2 = arith.constant 0 : i32
    return %c0_i32, %c0_i32_0, %c0_i32_1 : i32, i32, i32
  }
  func.func @transform_5(%arg0: i32) -> (i32, i32) {
    %c0_i32 = arith.constant 0 : i32
    %c0_i32_0 = arith.constant 0 : i32
    %c0_i32_1 = arith.constant 0 : i32
    return %c0_i32, %c0_i32_0 : i32, i32
  }
  func.func @transform_6(%arg0: i32) -> (i32, i32, i32) {
    %c0_i32 = arith.constant 0 : i32
    %c0_i32_0 = arith.constant 0 : i32
    %c0_i32_1 = arith.constant 0 : i32
    %c0_i32_2 = arith.constant 0 : i32
    return %c0_i32, %c0_i32_0, %c0_i32_1 : i32, i32, i32
  }
  func.func @transform_7(%arg0: i32) -> (i32, i32) {
    %c0_i32 = arith.constant 0 : i32
    %c0_i32_0 = arith.constant 0 : i32
    %c0_i32_1 = arith.constant 0 : i32
    return %c0_i32, %c0_i32_0 : i32, i32
  }
  func.func @transform_8(%arg0: i32) -> (i32, i32) {
    %c0_i32 = arith.constant 0 : i32
    %c0_i32_0 = arith.constant 0 : i32
    %c0_i32_1 = arith.constant 0 : i32
    return %c0_i32, %c0_i32_0 : i32, i32
  }
  func.func @transform_9(%arg0: i32) -> (i32, i32) {
    %c0_i32 = arith.constant 0 : i32
    %c0_i32_0 = arith.constant 0 : i32
    %c0_i32_1 = arith.constant 0 : i32
    return %c0_i32, %c0_i32_0 : i32, i32
  }
  func.func @transform_10(%arg0: i32) -> (i32, i32) {
    %c0_i32 = arith.constant 0 : i32
    %c0_i32_0 = arith.constant 0 : i32
    %c0_i32_1 = arith.constant 0 : i32
    return %c0_i32, %c0_i32_0 : i32, i32
  }
  func.func @transform_11(%arg0: i32) -> i32 {
    %c0_i32 = arith.constant 0 : i32
    %c0_i32_0 = arith.constant 0 : i32
    return %c0_i32 : i32
  }
  func.func @transform_12(%arg0: i32) -> (i32, i32) {
    %c0_i32 = arith.constant 0 : i32
    %c0_i32_0 = arith.constant 0 : i32
    return %arg0, %c0_i32 : i32, i32
  }
}

</mosaic_0001>

<bundles_post_ra>
// kernel: pnet2_forward.1
= control target key start
LH: loop header
LB: loop body
LE: loop exit
PB: predicated region body
PF: predicated region fallthrough
CT: control target
= control target key end

     0   :  { %17 = vsyncpa [#allocation3], 0  ;;  %s2173_s21 = smov 0   ;;  %s2497_s0 = inlined_call_operand.vmem [shape: f32[32,48], index: 0, kind: input, shape index: {}]   ;;  %s2498_s1 = inlined_call_operand.vmem [shape: bf16[3,48,70], index: 1, kind: input, shape index: {}]   ;;  %s2499_s2 = inlined_call_operand.vmem [shape: bf16[3,48,70], index: 2, kind: input, shape index: {}]   ;;  %s2500_s3 = inlined_call_operand.vmem [shape: f32[1,70], index: 3, kind: input, shape index: {}]   ;;  %s2501_s4 = inlined_call_operand.vmem [shape: bf16[3,70,80], index: 4, kind: input, shape index: {}]   ;;  %s2502_s5 = inlined_call_operand.vmem [shape: f32[1,80], index: 5, kind: input, shape index: {}]   ;;  %s2503_s6 = inlined_call_operand.vmem [shape: bf16[3,80,96], index: 6, kind: input, shape index: {}]   ;;  %s2504_s7 = inlined_call_operand.vmem [shape: f32[1,96], index: 7, kind: input, shape index: {}]   ;;  %s2505_s8 = inlined_call_operand.vmem [shape: bf16[96,48], index: 8, kind: input, shape index: {}]   ;;  %s2506_s9 = inlined_call_operand.vmem [shape: f32[1,48], index: 9, kind: input, shape index: {}]   ;;  %s2507_s10 = inlined_call_operand.vmem [shape: f32[1,48], index: 10, kind: input, shape index: {}]   ;;  %s2508_s11 = inlined_call_operand.vmem [shape: f32[3], index: 11, kind: input, shape index: {}]   ;;  %s2509_s12 = inlined_call_operand.vmem [shape: f32[32,48], index: 12, kind: output, shape index: {}]  }
   0x1 LB: > { %s1624_s22 = sadd.s32 4294967295, %s2103_s21   ;;  %p1626_p0 = scmp.ge.s32.totalorder %s2103_s21, 1  ;;  %s2103_s21 = sphi %s2173_s21, %s23_s21  }
   0x2   : > { %p311_p1 = scmp.lt.s32.totalorder %s2103_s21, 3  ;;  %s354_s25 = sshll.u32 %s2508_s11, 4  ;;  %s355_s25 = int_to_ptr.vmem [resolvable:$true] %s354_s25 }
   0x3   : > { %p2190_p3 = scmp.eq.s32.totalorder %s1624_s22, 0  ;;  %s2078_s28 = scalar_lea.vmem %s355_s25, 16 }
   0x4   : > { %p2184_p2 = pnand %p1626_p0, %p311_p1  ;;  %p2079_p6 = scmp.ne.s32.totalorder %s355_s25, %s2078_s28 }
   0x5   : > { %p2086_p10 = scmp.lt.s32.totalorder %s355_s25, %s355_s25  ;;  %p2087_p11 = scmp.lt.s32.totalorder %s2078_s28, %s2078_s28 }
   0x6   : > { %p2003_p4 = pneg %p2184_p2 }
   0x7   : > { %p2088_p12 = por %p2087_p11, %p2086_p10 }
   0x8   : > { %p2004_p5 = pnand %p2190_p3, %p2003_p4 }
   0xa   : > { %p2080_p7 = pneg %p2004_p5 }
   0xc   : > { %p2081_p8 = pnand %p2080_p7, %p2079_p6 }
   0xe   : > { %p2082_p9 = pneg %p2081_p8 }
  0x10   : > { %p2089_p13 = pnand %p2088_p12, %p2082_p9 }
  0x12   : > { %2092 = shalt.err (!%p2089_p13)
}
  0x13   : > { %s2105_s29 = smov [#allocation2]   ;;  %376 = sbr.rel (%p2184_p2) target bundleno = 1041 (0x411), region = 68 }
  0x14   : > { %2006 = dma.vmem_to_smem (!%p2004_p5), %s355_s25, 16, %s2105_s29, [#allocation3]  }
  0x1a   : > { %2098 = dma.done.wait (%p2190_p3), [#allocation3], 16  }
  0x1b   : > { %2100 = vsyncadd (%p2190_p3), [#allocation3], 4294967280 }
  0x1c   : > { %382 = sfence }
  0x1d   : > { %v2020_v0 = vld [vmem:[%s2498_s1 + $0x18] sm:$0xff]   ;;  %v2106_v1 = vmov 0.0   ;;  %v2021_v2 = vld [vmem:[%s2498_s1 + $0x20] sm:$0xff]   ;;  %vm2107_vm0 = vmmov 0   ;;  %s1631_s16 = sshll.u32 %s1624_s22, 1  ;;  %v2024_v3 = vld [vmem:[%s2498_s1 + $0x30] sm:$0xff]  }
  0x1e   : > { %1839 = vmatprep.subr.bf16.mxu1 %v2106_v1  ;;  %1859 = vmatprep.subr.bf16.mxu0 %v2106_v1  ;;  %p420_p0 = scmp.lt.s32.totalorder %s1631_s16, 3  ;;  %v2022_v4 = vld [vmem:[%s2498_s1 + $0x28] sm:$0xff]   ;;  %v2026_v5 = vld [vmem:[%s2498_s1 + $0x38] sm:$0xff]   ;;  %vm473_vm1 = vcmask 392192   ;;  %v2023_v9 = vld [vmem:[%s2498_s1] sm:$0xff]   ;;  %vm934_vm2 = vcmask 1042432  }
  0x1f   : > { %1840 = vmatpush3.bf16.msra.mxu1 %v2020_v0  ;;  %1845 = vmatprep.mubr.msk.bf16.mxu1 %vm2107_vm0, %v2106_v1  ;;  %v2028_v10 = vld [vmem:[%s2498_s1 + $0x40] sm:$0xff]   ;;  %v2025_v13 = vld [vmem:[%s2498_s1 + $0x8] sm:$0xff]   ;;  %v2027_v16 = vld [vmem:[%s2498_s1 + $0x10] sm:$0xff]   ;;  %s872_s13 = sld [smem:[#allocation2]]  ;;  %vm864_vm3 = vcmask 1046528   ;;  %vm930_vm6 = vcmask 572416  }
  0x20   : > { %1841 = vmatprep.subr.bf16.mxu1 %v2106_v1  ;;  %1865 = vmatprep.mubr.msk.bf16.mxu0 %vm2107_vm0, %v2106_v1  ;;  %s2513_s16 = smov (!%p420_p0, %s1631_s16), 3  ;;  %v2030_v15 = vld [vmem:[%s2499_s2] sm:$0xff]   ;;  %v2032_v19 = vld [vmem:[%s2499_s2 + $0x8] sm:$0xff]   ;;  %v2029_v20 = vld [vmem:[%s2499_s2 + $0x18] sm:$0xff]   ;;  %s1684_s14 = sld [smem:[#allocation2 + $0x1]]  ;;  %vm1212_vm9 = vcmask 654336  }
  0x21   : > { %s1632_s22 = sshll.u32 %s2513_s16, 3  ;;  %1860 = vmatpush3.bf16.msra.mxu0 %v2024_v3  ;;  %v2034_v22 = vld [vmem:[%s2499_s2 + $0x10] sm:$0xff]   ;;  %v2031_v23 = vld [vmem:[%s2499_s2 + $0x20] sm:$0xff]   ;;  %v2033_v24 = vld [vmem:[%s2499_s2 + $0x28] sm:$0xff]   ;;  %vm1484_vm11 = vcmask 785408   ;;  %vm1551_vm12 = vcmask 389120  }
  0x22   : > { %s423_s27 = scalar_lea.vmem %s2497_s0, %s1632_s22  ;;  %1861 = vmatprep.subr.bf16.mxu0 %v2106_v1  ;;  %v2035_v25 = vld [vmem:[%s2499_s2 + $0x30] sm:$0xff]   ;;  %v2036_v26 = vld [vmem:[%s2499_s2 + $0x38] sm:$0xff]   ;;  %v2037_v27 = vld [vmem:[%s2499_s2 + $0x40] sm:$0xff]   ;;  %s429_s19 = scalar_lea.vmem %s2509_s12, %s1632_s22  ;;  %vm1554_vm13 = vcmask 387072  }
  0x23   : > { %1842 = vmatpush3.bf16.msra.mxu1 %v2021_v2  ;;  %v435_v6 = vld [vmem:[%s423_s27 + $0x1] sm:$0xff]  ;;  %v436_v7 = vld [vmem:[%s423_s27 + $0x9] sm:$0x3f]  ;;  %v2042_v32 = vld [vmem:[%s2501_s4 + $0x10] sm:$0xff]   ;;  %1553 = vst.msk [vmem:[%s429_s19 + $0x5] sm:$0xff] %vm473_vm1, %v2106_v1 }
  0x24   : > { %1843 = vmatprep.subr.bf16.mxu1 %v2106_v1  ;;  %v437_v8 = vpack.c.bf16 %v436_v7, %v435_v6  ;;  %v438_v11 = vld [vmem:[%s423_s27 + $0x2] sm:$0xff]  ;;  %v439_v12 = vld [vmem:[%s423_s27 + $0xa] sm:$0x3f]  ;;  %v2043_v33 = vld [vmem:[%s2501_s4 + $0x34] sm:$0xff]   ;;  %1555 = vst.msk [vmem:[%s429_s19 + $0xd] sm:$0x7] %vm1554_vm13, %v2106_v1 }
  0x25   : > { %1862 = vmatpush3.bf16.msra.mxu0 %v2026_v5  ;;  %v440_v14 = vpack.c.bf16 %v439_v12, %v438_v11  ;;  %v432_v17 = vld [vmem:[%s423_s27] sm:$0xff]  ;;  %v433_v18 = vld [vmem:[%s423_s27 + $0x8] sm:$0x3f]  ;;  %v2044_v34 = vld [vmem:[%s2501_s4 + $0x18] sm:$0xff]   ;;  %s1722_s27 = sld [smem:[#allocation2 + $0x2]] }
  0x26   : > { %1863 = vmatprep.subr.bf16.mxu0 %v2106_v1  ;;  %v434_v21 = vpack.c.bf16 %v433_v18, %v432_v17  ;;  %v2038_v28 = vld [vmem:[%s2501_s4] sm:$0xff]   ;;  %v2040_v30 = vld [vmem:[%s2501_s4 + $0x8] sm:$0xff]   ;;  %v875_v18 = vstv %s872_s13 }
  0x27   : > { %1844 = vmatpush3.bf16.msra.mxu1 %v2022_v4  ;;  %v2039_v29 = vld [vmem:[%s2501_s4 + $0x24] sm:$0xff]   ;;  %v2041_v31 = vld [vmem:[%s2501_s4 + $0x2c] sm:$0xff]   ;;  %v2045_v35 = vld [vmem:[%s2501_s4 + $0x3c] sm:$0xff]  }
  0x28   : > { %1849 = vmatprep.subr.bf16.mxu1 %v2106_v1  ;;  %v2046_v36 = vld [vmem:[%s2501_s4 + $0x20] ss:$0 sps:$4 sm:$0x77]   ;;  %v2047_v37 = vld [vmem:[%s2501_s4 + $0x44] ss:$0 sps:$4 sm:$0x77]  }
  0x29   : > { %1864 = vmatpush3.bf16.msra.mxu0 %v2028_v10  ;;  %v1010_v38 = vsel %vm934_vm2, %v2046_v36, 0  ;;  %v936_v39 = vsel %vm934_vm2, %v2047_v37, 0  ;;  %v1659_v3 = vld [vmem:[%s2500_s3] ss:$0 sm:$0xff]  ;;  %v2054_v36 = vld [vmem:[%s2503_s6 + $0x28] sm:$0xff]  }
  0x2a   : > { %1846 = vmatmul.mubr.msk.bf16.vlgmr.msra.gmra.mrb[0].mxu1 %vm473_vm1, %v437_v8  ;;  %1879 = vmatprep.subr.bf16.mxu0 %v2106_v1  ;;  %v2055_v37 = vld [vmem:[%s2503_s6 + $0x8] sm:$0xff]  }
  0x2b   : > { %1850 = vmatpush3.bf16.msra.mxu1 %v2023_v9  ;;  %1855 = vmatprep.mubr.msk.bf16.mxu1 %vm2107_vm0, %v2106_v1 }
  0x2c   : > { %1851 = vmatprep.subr.bf16.mxu1 %v2106_v1  ;;  %1866 = vmatmul.mubr.msk.bf16.vlgmr.msra.gmra.mrb[0].mxu0 %vm473_vm1, %v440_v14 }
  0x2d   : > { %1880 = vmatpush3.bf16.msra.mxu0 %v2030_v15  ;;  %1885 = vmatprep.mubr.msk.bf16.mxu0 %vm2107_vm0, %v2106_v1 }
  0x2e   : > { %1881 = vmatprep.subr.bf16.mxu0 %v2106_v1 }
  0x2f   : > { %1852 = vmatpush3.bf16.msra.mxu1 %v2025_v13 }
  0x30   : > { %1853 = vmatprep.subr.bf16.mxu1 %v2106_v1 }
  0x31   : > { %1882 = vmatpush3.bf16.msra.mxu0 %v2032_v19 }
  0x32   : > { %1883 = vmatprep.subr.bf16.mxu0 %v2106_v1 }
  0x33   : > { %1854 = vmatpush3.bf16.msra.mxu1 %v2027_v16 }
  0x34   : > { %1869 = vmatprep.subr.bf16.mxu1 %v2106_v1 }
  0x35   : > { %1884 = vmatpush3.bf16.msra.mxu0 %v2034_v22 }
  0x36   : > { %1856 = vmatmul.mubr.msk.bf16.vlgmr.msra.gmra.mrb[4].mxu1 %vm473_vm1, %v434_v21  ;;  %1899 = vmatprep.subr.bf16.mxu0 %v2106_v1 }
  0x37   : > { %1870 = vmatpush3.bf16.msra.mxu1 %v2029_v20  ;;  %1875 = vmatprep.mubr.msk.bf16.mxu1 %vm2107_vm0, %v2106_v1 }
  0x38   : > { %1871 = vmatprep.subr.bf16.mxu1 %v2106_v1  ;;  %1886 = vmatmul.mubr.msk.bf16.vlgmr.msra.gmra.mrb[4].mxu0 %vm473_vm1, %v434_v21 }
  0x39   : > { %1909 = vmatprep.mubr.msk.bf16.mxu0 %vm2107_vm0, %v2106_v1  ;;  %1900 = vmatpush3.bf16.msra.mxu0 %v2039_v29  ;;  %v2049_v29 = vld [vmem:[%s2501_s4 + $0x50] sm:$0xff]  }
  0x3a   : > { %1901 = vmatprep.subr.bf16.mxu0 %v2106_v1 }
  0x3b   : > { %1872 = vmatpush3.bf16.msra.mxu1 %v2031_v23 }
  0x3c   : > { %1873 = vmatprep.subr.bf16.mxu1 %v2106_v1 }
  0x3d   : > { %1902 = vmatpush3.bf16.msra.mxu0 %v2041_v31  ;;  %v2051_v31 = vld [vmem:[%s2501_s4 + $0x60] sm:$0xff]  }
  0x3e   : > { %1903 = vmatprep.subr.bf16.mxu0 %v2106_v1 }
  0x3f   : > { %1874 = vmatpush3.bf16.msra.mxu1 %v2033_v24 }
  0x40   : > { %1889 = vmatprep.subr.bf16.mxu1 %v2106_v1 }
  0x41   : > { %1904 = vmatpush3.bf16.msra.mxu0 %v2043_v33 }
  0x42   : > { %1876 = vmatmul.mubr.msk.bf16.vlgmr.msra.gmra.mrb[8].mxu1 %vm473_vm1, %v437_v8  ;;  %1905 = vmatprep.subr.bf16.mxu0 %v2106_v1 }
  0x43   : > { %1890 = vmatpush3.bf16.msra.mxu1 %v2035_v25  ;;  %1895 = vmatprep.mubr.msk.bf16.mxu1 %vm2107_vm0, %v2106_v1 }
  0x44   : > { %1891 = vmatprep.subr.bf16.mxu1 %v2106_v1 }
  0x45   : > { %1906 = vmatpush3.bf16.msra.mxu0 %v2045_v35  ;;  %v2053_v35 = vld [vmem:[%s2503_s6] sm:$0xff]  }
  0x46   : > { %1907 = vmatprep.subr.bf16.mxu0 %v2106_v1 }
  0x47   : > { %1892 = vmatpush3.bf16.msra.mxu1 %v2036_v26 }
  0x48   : > { %1893 = vmatprep.subr.bf16.mxu1 %v2106_v1 }
  0x49   : > { %1908 = vmatpush3.bf16.msra.mxu0 %v936_v39  ;;  %v2057_v39 = vld [vmem:[%s2503_s6 + $0x10] sm:$0xff]  }
  0x4a   : > { %1927 = vmatprep.subr.bf16.mxu0 %v2106_v1 }
  0x4b   : > { %1894 = vmatpush3.bf16.msra.mxu1 %v2037_v27  ;;  %v2048_v27 = vld [vmem:[%s2501_s4 + $0x48] sm:$0xff]  }
  0x4c   : > { %1913 = vmatprep.subr.bf16.mxu1 %v2106_v1 }
  0x4e   : > { %1896 = vmatmul.mubr.msk.bf16.vlgmr.msra.gmra.mrb[12].mxu1 %vm473_vm1, %v440_v14 }
  0x4f   : > { %1923 = vmatprep.mubr.msk.bf16.mxu1 %vm2107_vm0, %v2106_v1  ;;  %1914 = vmatpush3.bf16.msra.mxu1 %v2038_v28 }
  0x50   : > { %1915 = vmatprep.subr.bf16.mxu1 %v2106_v1 }
  0x53   : > { %1916 = vmatpush3.bf16.msra.mxu1 %v2040_v30  ;;  %v2050_v30 = vld [vmem:[%s2501_s4 + $0x58] sm:$0xff]  }
  0x54   : > { %1917 = vmatprep.subr.bf16.mxu1 %v2106_v1 }
  0x57   : > { %1918 = vmatpush3.bf16.msra.mxu1 %v2042_v32  ;;  %v2052_v32 = vld [vmem:[%s2501_s4 + $0x68] ss:$0 sps:$4 sm:$0x77]  }
  0x58   : > { %1919 = vmatprep.subr.bf16.mxu1 %v2106_v1  ;;  %v1095_v33 = vsel %vm934_vm2, %v2052_v32, 0 }
  0x5b   : > { %1920 = vmatpush3.bf16.msra.mxu1 %v2044_v34 }
  0x5c   : > { %1921 = vmatprep.subr.bf16.mxu1 %v2106_v1 }
  0x5f   : > { %1922 = vmatpush3.bf16.msra.mxu1 %v1010_v38  ;;  %v2056_v38 = vld [vmem:[%s2503_s6 + $0x30] sm:$0xff]  }
  0x60   : > { %1941 = vmatprep.subr.bf16.mxu1 %v2106_v1 }
  0xfd   : > { %v511_v40 = vpop.f32.mrb[0].mxu1 }
  0xfe   : > { %v1847_v41 = vpop.f32.mrb[1].mxu1 }
  0xff   : > { %v514_v42 = vpop.f32.mrb[2].mxu1  ;;  %v642_v44 = vpop.f32.mrb[0].mxu0  ;;  %v2059_v41 = vld [vmem:[%s2503_s6 + $0x18] sm:$0xff]  }
 0x100   : > { %v1848_v43 = vpop.f32.mrb[3].mxu1  ;;  %v1867_v45 = vpop.f32.mrb[1].mxu0 }
 0x101   : > { %v645_v46 = vpop.f32.mrb[2].mxu0  ;;  %v2061_v43 = vld [vmem:[%s2503_s6 + $0x20] sm:$0xff]  }
 0x102   : > { %v1868_v47 = vpop.f32.mrb[3].mxu0 }
 0x109   : > { %v573_v48 = vpop.f32.mrb[4].mxu1 }
 0x10a   : > { %v574_v49 = vadd.f32 %v573_v48, %v511_v40  ;;  %v1857_v50 = vpop.f32.mrb[5].mxu1  ;;  %v2058_v40 = vld [vmem:[%s2503_s6 + $0x38] sm:$0xff]  }
 0x10b   : > { %v576_v51 = vpop.f32.mrb[6].mxu1  ;;  %v783_v56 = vpop.f32.mrb[4].mxu0 }
 0x10c   : > { %v577_v52 = vadd.f32 %v576_v51, %v514_v42  ;;  %v649_v53 = vadd.f32 %v642_v44, %v574_v49  ;;  %v1858_v54 = vpop.f32.mrb[7].mxu1  ;;  %v1887_v57 = vpop.f32.mrb[5].mxu0  ;;  %v2060_v42 = vld [vmem:[%s2503_s6 + $0x40] sm:$0xff]   ;;  %v2062_v44 = vld [vmem:[%s2503_s6 + $0x48] sm:$0xff]  }
 0x10d   : > { %v786_v58 = vpop.f32.mrb[6].mxu0 }
 0x10e   : > { %v650_v55 = vadd.f32 %v645_v46, %v577_v52  ;;  %v1888_v59 = vpop.f32.mrb[7].mxu0  ;;  %v657_v8 = vadd.f32 %v1659_v3, %v649_v53 }
 0x10f   : > { %v1151_v59 = vstv %s1684_s14 }
 0x110   : > { %v658_v12 = vadd.f32 %v1659_v3, %v650_v55 }
 0x115   : > { %v724_v60 = vpop.f32.mrb[8].mxu1 }
 0x116   : > { %v784_v61 = vadd.f32 %v783_v56, %v724_v60  ;;  %v1877_v62 = vpop.f32.mrb[9].mxu1  ;;  %v1721_v56 = vld [vmem:[%s2502_s5] ss:$0 sm:$0xff] }
 0x117   : > { %v727_v63 = vpop.f32.mrb[10].mxu1 }
 0x118   : > { %v787_v0 = vadd.f32 %v786_v58, %v727_v63  ;;  %v1878_v2 = vpop.f32.mrb[11].mxu1 }
 0x121   : > { %v849_v4 = vpop.f32.mrb[12].mxu1 }
 0x122   : > { %v856_v5 = vadd.f32 %v849_v4, %v784_v61  ;;  %v1897_v6 = vpop.f32.mrb[13].mxu1 }
 0x123   : > { %v852_v7 = vpop.f32.mrb[14].mxu1 }
 0x124   : > { %v858_v9 = vadd.f32 %v1659_v3, %v856_v5  ;;  %v857_v10 = vadd.f32 %v852_v7, %v787_v0  ;;  %v1898_v11 = vpop.f32.mrb[15].mxu1  ;;  %v2063_v7 = vld [vmem:[%s2503_s6 + $0x50] sm:$0xff]  }
 0x125   : > { %v2065_v11 = vld [vmem:[%s2503_s6 + $0x60] sm:$0xff]  }
 0x126   : > { %v860_v13 = vmax.f32 %v657_v8, %v858_v9  ;;  %v859_v14 = vadd.f32 %v1659_v3, %v857_v10  ;;  %v2064_v10 = vld [vmem:[%s2503_s6 + $0x58] sm:$0xff]  }
 0x128   : > { %v861_v15 = vmax.f32 %v658_v12, %v859_v14  ;;  %v865_v16 = vrot.slane %v860_v13, 1  ;;  %v2066_v12 = vld [vmem:[%s2503_s6 + $0x68] sm:$0xff]  }
 0x12a   : > { %v866_v17 = vrot.slane %v861_v15, 1 }
 0x12c   : > { %v867_v19 = vsel %vm864_vm3, %v865_v16, %v866_v17  ;;  %v871_v20 = vmax.f32 %v861_v15, %v866_v17  ;;  %v2068_v15 = vld [vmem:[%s2505_s8] sm:$0xff]   ;;  %v2069_v16 = vld [vmem:[%s2505_s8 + $0x8] sm:$0xff]   ;;  %v2070_v17 = vld [vmem:[%s2505_s8 + $0x10] sm:$0xff]  }
 0x12d   : > { %v870_v21 = vmax.f32 %v860_v13, %v867_v19  ;;  %v2067_v13 = vld [vmem:[%s2503_s6 + $0x70] sm:$0xff]   ;;  %v2072_v19 = vld [vmem:[%s2505_s8 + $0x20] sm:$0xff]  }
 0x12e   : > { %vm874_vm4 = vcmp.gt.f32.partialorder %v871_v20, 0.0  ;;  %v877_v22 = vmul.f32 %v875_v18, %v871_v20 }
 0x12f   : > { %v876_v23 = vmul.f32 %v875_v18, %v870_v21  ;;  %vm873_vm5 = vcmp.gt.f32.partialorder %v870_v21, 0.0  ;;  %v2071_v18 = vld [vmem:[%s2505_s8 + $0x18] sm:$0xff]  }
 0x130   : > { %v879_v24 = vsel %vm874_vm4, %v871_v20, %v877_v22  ;;  %v2073_v20 = vld [vmem:[%s2505_s8 + $0x28] sm:$0xff]  }
 0x131   : > { %v878_v25 = vsel %vm873_vm5, %v870_v21, %v876_v23 }
 0x132   : > { %v881_v26 = vpack.c.bf16 %v879_v24, %v878_v25 }
 0x134   : > { %1924 = vmatmul.mubr.msk.bf16.vlgmr.msra.gmra.mrb[16].mxu1 %vm930_vm6, %v881_v26  ;;  %v902_v28 = vrot.slane %v881_v26, 1  ;;  %v1063_v34 = vrot.slane %v881_v26, 2 }
 0x135   : > { %1951 = vmatprep.mubr.msk.bf16.mxu1 %vm2107_vm0, %v2106_v1  ;;  %1942 = vmatpush3.bf16.msra.mxu1 %v2054_v36 }
 0x136   : > { %1910 = vmatmul.mubr.msk.bf16.vlgmr.msra.gmra.mrb[8].mxu0 %vm930_vm6, %v902_v28  ;;  %1943 = vmatprep.subr.bf16.mxu1 %v2106_v1 }
 0x137   : > { %1928 = vmatpush3.bf16.msra.mxu0 %v2048_v27  ;;  %1937 = vmatprep.mubr.msk.bf16.mxu0 %vm2107_vm0, %v2106_v1 }
 0x138   : > { %1929 = vmatprep.subr.bf16.mxu0 %v2106_v1 }
 0x139   : > { %1944 = vmatpush3.bf16.msra.mxu1 %v2056_v38 }
 0x13a   : > { %1945 = vmatprep.subr.bf16.mxu1 %v2106_v1 }
 0x13b   : > { %1930 = vmatpush3.bf16.msra.mxu0 %v2049_v29 }
 0x13c   : > { %1931 = vmatprep.subr.bf16.mxu0 %v2106_v1 }
 0x13d   : > { %1946 = vmatpush3.bf16.msra.mxu1 %v2058_v40 }
 0x13e   : > { %1947 = vmatprep.subr.bf16.mxu1 %v2106_v1 }
 0x13f   : > { %1932 = vmatpush3.bf16.msra.mxu0 %v2050_v30 }
 0x140   : > { %1933 = vmatprep.subr.bf16.mxu0 %v2106_v1 }
 0x141   : > { %1948 = vmatpush3.bf16.msra.mxu1 %v2060_v42 }
 0x142   : > { %1949 = vmatprep.subr.bf16.mxu1 %v2106_v1 }
 0x143   : > { %1934 = vmatpush3.bf16.msra.mxu0 %v2051_v31  ;;  %v1761_v31 = vld [vmem:[%s2504_s7] ss:$0 sm:$0xff] }
 0x144   : > { %1935 = vmatprep.subr.bf16.mxu0 %v2106_v1 }
 0x145   : > { %1950 = vmatpush3.bf16.msra.mxu1 %v2062_v44 }
 0x146   : > { %1969 = vmatprep.subr.bf16.mxu1 %v2106_v1 }
 0x147   : > { %1936 = vmatpush3.bf16.msra.mxu0 %v1095_v33 }
 0x148   : > { %1955 = vmatprep.subr.bf16.mxu0 %v2106_v1 }
 0x14a   : > { %1938 = vmatmul.mubr.msk.bf16.vlgmr.msra.gmra.mrb[12].mxu0 %vm930_vm6, %v1063_v34  ;;  %v1425_v34 = vstv %s1722_s27 }
 0x14b   : > { %1965 = vmatprep.mubr.msk.bf16.mxu0 %vm2107_vm0, %v2106_v1  ;;  %1956 = vmatpush3.bf16.msra.mxu0 %v2053_v35 }
 0x14c   : > { %1957 = vmatprep.subr.bf16.mxu0 %v2106_v1 }
 0x14f   : > { %1958 = vmatpush3.bf16.msra.mxu0 %v2055_v37 }
 0x150   : > { %1959 = vmatprep.subr.bf16.mxu0 %v2106_v1 }
 0x153   : > { %1960 = vmatpush3.bf16.msra.mxu0 %v2057_v39 }
 0x154   : > { %1961 = vmatprep.subr.bf16.mxu0 %v2106_v1 }
 0x157   : > { %1962 = vmatpush3.bf16.msra.mxu0 %v2059_v41  ;;  %v1762_v41 = vld [vmem:[%s2506_s9] ss:$0 sm:$0xff] }
 0x158   : > { %1963 = vmatprep.subr.bf16.mxu0 %v2106_v1 }
 0x15b   : > { %1964 = vmatpush3.bf16.msra.mxu0 %v2061_v43 }
 0x15c   : > { %1983 = vmatprep.subr.bf16.mxu0 %v2106_v1 }
 0x207   : > { %v1046_v45 = vpop.f32.mrb[16].mxu1 }
 0x208   : > { %v1925_v46 = vpop.f32.mrb[17].mxu1 }
 0x209   : > { %v972_v47 = vpop.f32.mrb[8].mxu0  ;;  %v1049_v48 = vpop.f32.mrb[18].mxu1 }
 0x20a   : > { %v1047_v49 = vadd.f32 %v1046_v45, %v972_v47  ;;  %v1911_v50 = vpop.f32.mrb[9].mxu0  ;;  %v1926_v51 = vpop.f32.mrb[19].mxu1 }
 0x20b   : > { %v975_v52 = vpop.f32.mrb[10].mxu0 }
 0x20c   : > { %v1050_v53 = vadd.f32 %v1049_v48, %v975_v52  ;;  %v1912_v54 = vpop.f32.mrb[11].mxu0 }
 0x21d   : > { %v1131_v55 = vpop.f32.mrb[12].mxu0 }
 0x21e   : > { %v1138_v57 = vadd.f32 %v1131_v55, %v1047_v49  ;;  %v1939_v58 = vpop.f32.mrb[13].mxu0  ;;  %v1536_v49 = vlaneseq }
 0x21f   : > { %v1134_v60 = vpop.f32.mrb[14].mxu0 }
 0x220   : > { %v1147_v61 = vadd.f32 %v1721_v56, %v1138_v57  ;;  %v1139_v62 = vadd.f32 %v1134_v60, %v1050_v53  ;;  %v1940_v63 = vpop.f32.mrb[15].mxu0  ;;  %v1537_v52 = vshrl.u32 %v1536_v49, 7  ;;  %v1534_v53 = vld [vmem:[%s2507_s10] sm:$0x1] }
 0x221   : > { %v1542_v55 = vsub.f32 1.0, %v1534_v53 }
 0x222   : > { %vm1149_vm7 = vcmp.gt.f32.partialorder %v1147_v61, 0.0  ;;  %v1152_v0 = vmul.f32 %v1151_v59, %v1147_v61  ;;  %v1148_v2 = vadd.f32 %v1721_v56, %v1139_v62  ;;  %v1538_v54 = vsub.s32 0, %v1537_v52 }
 0x224   : > { %v1154_v3 = vsel %vm1149_vm7, %v1147_v61, %v1152_v0  ;;  %vm1150_vm8 = vcmp.gt.f32.partialorder %v1148_v2, 0.0  ;;  %v1153_v4 = vmul.f32 %v1151_v59, %v1148_v2  ;;  %v1539_v56 = vrot.slane %v1534_v53, %v1538_v54 }
 0x225   : > { %v1157_v5 = vpack.c.bf16 %v1154_v3, %v1154_v3  ;;  %v1547_v57 = vrot.slane %v1542_v55, %v1538_v54 }
 0x226   : > { %v1155_v6 = vsel %vm1150_vm8, %v1148_v2, %v1153_v4 }
 0x227   : > { %v1181_v8 = vrot.slane %v1157_v5, 1  ;;  %v1158_v9 = vpack.c.bf16 %v1155_v6, %v1154_v3  ;;  %1966 = vmatmul.mubr.msk.bf16.vlgmr.msra.gmra.mrb[16].mxu0 %vm1212_vm9, %v1157_v5 }
 0x228   : > { %1995 = vmatprep.mubr.msk.bf16.mxu0 %vm2107_vm0, %v2106_v1  ;;  %1984 = vmatpush3.bf16.msra.mxu0 %v2068_v15 }
 0x229   : > { %1952 = vmatmul.mubr.msk.bf16.vlgmr.msra.gmra.mrb[20].mxu1 %vm1212_vm9, %v1181_v8  ;;  %v1341_v14 = vrot.slane %v1158_v9, 2  ;;  %1985 = vmatprep.subr.bf16.mxu0 %v2106_v1 }
 0x22a   : > { %1970 = vmatpush3.bf16.msra.mxu1 %v2063_v7  ;;  %1979 = vmatprep.mubr.msk.bf16.mxu1 %vm2107_vm0, %v2106_v1 }
 0x22b   : > { %1971 = vmatprep.subr.bf16.mxu1 %v2106_v1 }
 0x22c   : > { %1986 = vmatpush3.bf16.msra.mxu0 %v2069_v16 }
 0x22d   : > { %1987 = vmatprep.subr.bf16.mxu0 %v2106_v1 }
 0x22e   : > { %1972 = vmatpush3.bf16.msra.mxu1 %v2064_v10 }
 0x22f   : > { %1973 = vmatprep.subr.bf16.mxu1 %v2106_v1 }
 0x230   : > { %1988 = vmatpush3.bf16.msra.mxu0 %v2070_v17 }
 0x231   : > { %1989 = vmatprep.subr.bf16.mxu0 %v2106_v1 }
 0x232   : > { %1974 = vmatpush3.bf16.msra.mxu1 %v2065_v11 }
 0x233   : > { %1975 = vmatprep.subr.bf16.mxu1 %v2106_v1 }
 0x234   : > { %1990 = vmatpush3.bf16.msra.mxu0 %v2071_v18 }
 0x235   : > { %1991 = vmatprep.subr.bf16.mxu0 %v2106_v1 }
 0x236   : > { %1976 = vmatpush3.bf16.msra.mxu1 %v2066_v12 }
 0x237   : > { %1977 = vmatprep.subr.bf16.mxu1 %v2106_v1 }
 0x238   : > { %1992 = vmatpush3.bf16.msra.mxu0 %v2072_v19 }
 0x239   : > { %1993 = vmatprep.subr.bf16.mxu0 %v2106_v1 }
 0x23a   : > { %1978 = vmatpush3.bf16.msra.mxu1 %v2067_v13 }
 0x23c   : > { %1994 = vmatpush3.bf16.msra.mxu0 %v2073_v20 }
 0x23d   : > { %1980 = vmatmul.mubr.msk.bf16.vlgmr.msra.gmra.mrb[24].mxu1 %vm1212_vm9, %v1341_v14 }
 0x2fa   : > { %v1323_v21 = vpop.f32.mrb[16].mxu0 }
 0x2fb   : > { %v1967_v22 = vpop.f32.mrb[17].mxu0 }
 0x2fc   : > { %v1250_v23 = vpop.f32.mrb[20].mxu1  ;;  %v1326_v24 = vpop.f32.mrb[18].mxu0 }
 0x2fd   : > { %v1324_v25 = vadd.f32 %v1323_v21, %v1250_v23  ;;  %v1953_v26 = vpop.f32.mrb[21].mxu1  ;;  %v1968_v27 = vpop.f32.mrb[19].mxu0 }
 0x2fe   : > { %v1253_v28 = vpop.f32.mrb[22].mxu1 }
 0x2ff   : > { %v1954_v29 = vpop.f32.mrb[23].mxu1 }
 0x310   : > { %v1409_v30 = vpop.f32.mrb[24].mxu1 }
 0x311   : > { %v1415_v32 = vadd.f32 %v1409_v30, %v1324_v25  ;;  %v1981_v33 = vpop.f32.mrb[25].mxu1 }
 0x312   : > { %v1412_v35 = vpop.f32.mrb[26].mxu1 }
 0x313   : > { %v1423_v36 = vadd.f32 %v1761_v31, %v1415_v32  ;;  %v1982_v37 = vpop.f32.mrb[27].mxu1 }
 0x315   : > { %vm1424_vm10 = vcmp.gt.f32.partialorder %v1423_v36, 0.0  ;;  %v1426_v38 = vmul.f32 %v1425_v34, %v1423_v36 }
 0x317   : > { %v1427_v39 = vsel %vm1424_vm10, %v1423_v36, %v1426_v38 }
 0x318   : > { %v1428_v40 = vpack.c.bf16 %v1427_v39, %v1427_v39 }
 0x31a   : > { %1996 = vmatmul.mubr.msk.bf16.vlgmr.msra.gmra.mrb[20].mxu0 %vm1484_vm11, %v1428_v40 }
 0x3ed   : > { %v1522_v42 = vpop.f32.mrb[20].mxu0 }
 0x3ee   : > { %v1523_v43 = vadd.f32 %v1762_v41, %v1522_v42  ;;  %v1997_v44 = vpop.f32.mrb[21].mxu0 }
 0x3ef   : > { %v1525_v45 = vpop.f32.mrb[22].mxu0 }
 0x3f0   : > { %v1528_v46 = vsub.f32 0.0, %v1523_v43  ;;  %v1998_v47 = vpop.f32.mrb[23].mxu0  ;;  %v1549_v60 = vmul.f32 %v1547_v57, %v1523_v43 }
 0x3f2   : > { %v1529_v48 = vmul.f32 1.442695, %v1528_v46 }
 0x3f4   : > { %2074 = vpow2.f32 %v1529_v48 }
 0x3fe   : > { %v2075_v50 = vpop.eup %2074 }
 0x3ff   : > { %v1531_v51 = vadd.f32 1.0, %v2075_v50 }
 0x401   : > { %2076 = vrcp.f32 %v1531_v51 }
 0x40b   : > { %v2077_v58 = vpop.eup %2076 }
 0x40c   : > { %v1541_v59 = vmul.f32 %v2077_v58, %v1539_v56 }
 0x40e   : > { %v1550_v61 = vadd.f32 %v1549_v60, %v1541_v59 }
 0x410   : > { %1552 = vst.msk [vmem:[%s429_s19] sm:$0x1f] %vm1551_vm12, %v1550_v61 }
 0x411 PF: > { %s23_s21 = sadd.s32 1, %s2103_s21  }
 0x412   : > { %p20_p1 = scmp.ge.s32.totalorder %s23_s21, 4  }
 0x414   :  { %22 = sbr.rel (!%p20_p1) target bundleno = 1 (0x1), region = 111 }
 0x41b   :  { %1578 = vsyncpa [#allocation3], 1 }
 0x41c   :  { %1580 = vsyncpa [#allocation3 + $0x1], 1 }

</bundles_post_ra>
